<compile_context>
chip_gen: v7x
topology: tpu7x:2x2x1
jax: 0.10.0
libtpu: 0.0.40
codegen_flags: <defaults>
</compile_context>

<pallas_src>
import jax
import jax.numpy as jnp
from jax.experimental import pallas as pl
from jax.experimental.pallas import tpu as pltpu


def _pick_hw_tile(hw, c, itemsize, max_tile=1024, target_block_bytes=4 << 20):
    """Largest multiple of 128 dividing hw, bounded by max_tile and a per-block
    VMEM budget.  Falls back to the full extent (block dim == array dim is legal)."""
    cap = (target_block_bytes // max(c * itemsize, 1)) // 128 * 128
    cap = min(max(cap, 128), max_tile, hw)
    for cand in range(cap - cap % 128, 0, -128):
        if hw % cand == 0:
            return cand
    return hw


def _pool_kernel(x_ref, sum_ref):
    """Accumulate per-channel sums over HW tiles.
    x_ref: (1, C, HW_TILE); sum_ref: (1, C, 1) f32, resident across the HW grid axis."""
    @pl.when(pl.program_id(1) == 0)
    def _():
        sum_ref[...] = jnp.zeros_like(sum_ref)

    # Lane-axis reduce (XLU slot); accumulate in f32.
    sum_ref[...] += jnp.sum(x_ref[...].astype(jnp.float32), axis=2, keepdims=True)


def _scale_kernel(x_ref, s_ref, o_ref):
    """Pure broadcast-multiply: per-channel scale broadcast along the lane (HW) axis.
    x_ref/o_ref: (1, C, HW_TILE); s_ref: (1, C, 1)."""
    o_ref[...] = (x_ref[...] * s_ref[...]).astype(o_ref.dtype)


def ca_layer(x_nchw, w1, b1, w2, b2):
    """x_nchw: (N, C, H, W); w1: (Cr, C, 1, 1); b1: (Cr,); w2: (C, Cr, 1, 1); b2: (C,)."""
    N, C, H, W = x_nchw.shape
    Cr = w1.shape[0]
    HW = H * W
    itemsize = x_nchw.dtype.itemsize

    # NCHW -> (N, C, HW): pure reshape, no data movement.  C -> sublanes, HW -> lanes.
    x = x_nchw.reshape(N, C, HW)

    hw_tile = _pick_hw_tile(HW, C, itemsize)
    T = HW // hw_tile
    blk_bytes = C * hw_tile * itemsize
    vmem_limit = int(min(max(32 << 20, 8 * blk_bytes), 128 << 20))

    # ---- pass 1: streaming global average pool (channel sums, f32 accumulation) ----
    pooled = pl.pallas_call(
        _pool_kernel,
        out_shape=jax.ShapeDtypeStruct((N, C, 1), jnp.float32),
        grid_spec=pltpu.PrefetchScalarGridSpec(
            num_scalar_prefetch=0,
            grid=(N, T),
            in_specs=[pl.BlockSpec((1, C, hw_tile), lambda n, t: (n, 0, t))],
            out_specs=pl.BlockSpec((1, C, 1), lambda n, t: (n, 0, 0)),
        ),
        compiler_params=pltpu.CompilerParams(
            dimension_semantics=("parallel", "arbitrary"),
            vmem_limit_bytes=vmem_limit),
        cost_estimate=pl.CostEstimate(
            flops=N * C * HW, transcendentals=0,
            bytes_accessed=N * C * HW * itemsize + N * C * 4),
    )(x)

    # ---- tiny squeeze-excite MLP on the pooled (N, C) vector (plain JAX; negligible) ----
    y = pooled.reshape(N, C) * (1.0 / float(HW))
    w1_m = w1.reshape(Cr, C).astype(jnp.float32)
    w2_m = w2.reshape(C, Cr).astype(jnp.float32)
    h = jnp.maximum(y @ w1_m.T + b1.astype(jnp.float32)[None, :], 0.0)   # (N, Cr)
    s = jax.nn.sigmoid(h @ w2_m.T + b2.astype(jnp.float32)[None, :])     # (N, C)
    s = s.astype(x.dtype).reshape(N, C, 1)

    # ---- pass 2: lane-dense broadcast-multiply scale ----
    out = pl.pallas_call(
        _scale_kernel,
        out_shape=jax.ShapeDtypeStruct((N, C, HW), x.dtype),
        grid_spec=pltpu.PrefetchScalarGridSpec(
            num_scalar_prefetch=0,
            grid=(N, T),
            in_specs=[pl.BlockSpec((1, C, hw_tile), lambda n, t: (n, 0, t)),
                      pl.BlockSpec((1, C, 1), lambda n, t: (n, 0, 0))],
            out_specs=pl.BlockSpec((1, C, hw_tile), lambda n, t: (n, 0, t)),
        ),
        compiler_params=pltpu.CompilerParams(
            dimension_semantics=("parallel", "parallel"),
            vmem_limit_bytes=vmem_limit),
        cost_estimate=pl.CostEstimate(
            flops=N * C * HW, transcendentals=0,
            bytes_accessed=2 * N * C * HW * itemsize + N * C * itemsize),
    )(x, s)

    return out.reshape(N, C, H, W)


def ca_layer_ref(x, w1, b1, w2, b2):
    """Pure-JAX reference mirroring the PyTorch forward."""
    N, C, H, W = x.shape
    Cr = w1.shape[0]
    y = jnp.mean(x, axis=(2, 3))                              # (N, C)
    h = jnp.maximum(y @ w1.reshape(Cr, C).T + b1, 0.0)        # (N, Cr)
    s = jax.nn.sigmoid(h @ w2.reshape(C, Cr).T + b2)          # (N, C)
    return x * s[:, :, None, None]


if __name__ == "__main__":
    def check(n, c, h, w, key):
        cr = c // 8
        kx, k1, k2, k3, k4 = jax.random.split(key, 5)
        x = jax.random.normal(kx, (n, c, h, w), dtype=jnp.float32)
        w1 = jax.random.normal(k1, (cr, c, 1, 1), dtype=jnp.float32) * 0.1
        b1 = jax.random.normal(k2, (cr,), dtype=jnp.float32) * 0.1
        w2 = jax.random.normal(k3, (c, cr, 1, 1), dtype=jnp.float32) * 0.1
        b2 = jax.random.normal(k4, (c,), dtype=jnp.float32) * 0.1
        out = jax.block_until_ready(ca_layer(x, w1, b1, w2, b2))
        ref = jax.block_until_ready(ca_layer_ref(x, w1, b1, w2, b2))
        assert out.shape == (n, c, h, w)
        assert jnp.allclose(out, ref, atol=1e-5, rtol=1e-5), \
            float(jnp.max(jnp.abs(out - ref)))

    key = jax.random.PRNGKey(0)
    k0, k1, k2 = jax.random.split(key, 3)
    check(2, 32, 16, 16, k0)   # HW=256  -> hw_tile=256,  T=1
    check(1, 32, 40, 48, k1)   # HW=1920 -> hw_tile=640,  T=3 (exercises the accumulator)
    check(1, 16, 6, 7, k2)     # HW=42   -> fallback full-width block
    print("KERNEL_OK")
</pallas_src>

<mosaic_0001>
module attributes {stable_mosaic.version = 11 : i64} {
  func.func @_pool_kernel(%arg0: i32, %arg1: i32, %arg2: memref<1x32x256xf32, #tpu.memory_space<vmem>>, %arg3: memref<1x32x1xf32, #tpu.memory_space<vmem>>) attributes {dimension_semantics = [#tpu.dimension_semantics<parallel>, #tpu.dimension_semantics<arbitrary>], iteration_bounds = array<i64: 2, 1>, scalar_prefetch = 0 : i64, scratch_operands = 0 : i64, tpu.core_type = #tpu.core_type<tc>, window_params = [{transform_indices = @transform_0, window_bounds = array<i64: 1, 32, 256>}, {transform_indices = @transform_1, window_bounds = array<i64: 1, 32, 1>}]} {
    %c0_i32 = arith.constant 0 : i32
    %0 = arith.cmpi eq, %arg1, %c0_i32 : i32
    %1 = arith.extui %0 : i1 to i32
    %c0_i32_0 = arith.constant 0 : i32
    %2 = arith.cmpi ne, %1, %c0_i32_0 : i32
    scf.if %2 {
      %cst_9 = arith.constant 0.000000e+00 : f32
      %9 = vector.broadcast %cst_9 : f32 to vector<1x32x1xf32>
      %c0_10 = arith.constant 0 : index
      %c0_11 = arith.constant 0 : index
      %c0_12 = arith.constant 0 : index
      %10 = vector.load %arg3[%c0_10, %c0_11, %c0_12] : memref<1x32x1xf32, #tpu.memory_space<vmem>>, vector<1x32x1xf32>
      tpu.vector_store %arg3[%c0_10, %c0_11, %c0_12], %9 {strides = array<i32>} : memref<1x32x1xf32, #tpu.memory_space<vmem>>, vector<1x32x1xf32>,
    } else {
    }
    %c0 = arith.constant 0 : index
    %c0_1 = arith.constant 0 : index
    %c0_2 = arith.constant 0 : index
    %3 = vector.load %arg3[%c0, %c0_1, %c0_2] : memref<1x32x1xf32, #tpu.memory_space<vmem>>, vector<1x32x1xf32>
    %c0_3 = arith.constant 0 : index
    %c0_4 = arith.constant 0 : index
    %c0_5 = arith.constant 0 : index
    %4 = vector.load %arg2[%c0_3, %c0_4, %c0_5] : memref<1x32x256xf32, #tpu.memory_space<vmem>>, vector<1x32x256xf32>
    %cst = arith.constant dense<0.000000e+00> : vector<1x32xf32>
    %5 = vector.multi_reduction <add>, %4, %cst [2] : vector<1x32x256xf32> to vector<1x32xf32>
    %6 = vector.shape_cast %5 : vector<1x32xf32> to vector<1x32x1xf32>
    %7 = arith.addf %3, %6 : vector<1x32x1xf32>
    %c0_6 = arith.constant 0 : index
    %c0_7 = arith.constant 0 : index
    %c0_8 = arith.constant 0 : index
    %8 = vector.load %arg3[%c0_6, %c0_7, %c0_8] : memref<1x32x1xf32, #tpu.memory_space<vmem>>, vector<1x32x1xf32>
    tpu.vector_store %arg3[%c0_6, %c0_7, %c0_8], %7 {strides = array<i32>} : memref<1x32x1xf32, #tpu.memory_space<vmem>>, vector<1x32x1xf32>,
    return
  }
  func.func @transform_0(%arg0: i32, %arg1: i32) -> (i32, i32, i32) {
    %c0_i32 = arith.constant 0 : i32
    %c0_i32_0 = arith.constant 0 : i32
    return %arg0, %c0_i32, %arg1 : i32, i32, i32
  }
  func.func @transform_1(%arg0: i32, %arg1: i32) -> (i32, i32, i32) {
    %c0_i32 = arith.constant 0 : i32
    %c0_i32_0 = arith.constant 0 : i32
    %c0_i32_1 = arith.constant 0 : i32
    return %arg0, %c0_i32, %c0_i32_0 : i32, i32, i32
  }
}

</mosaic_0001>

<bundles_post_ra>
// kernel: tpu_custom_call.1
= control target key start
LH: loop header
LB: loop body
LE: loop exit
PB: predicated region body
PF: predicated region fallthrough
CT: control target
= control target key end

     0   :  { %6 = vsyncpa [#allocation3], 0  ;;  %s589_s0 = inlined_call_operand.hbm [shape: f32[2,32,256], index: 0, kind: input, shape index: {}]   ;;  %s590_s1 = inlined_call_operand.vmem [shape: f32[2,32,1], index: 1, kind: output, shape index: {}]  }
   0x1   :  { %8 = vsyncpa [#allocation3 + $0x1], 0  ;;  %s443_s6 = smov 0   ;;  %s445_s7 = smov 0  }
   0x2   :  { %s447_s8 = smov 0   ;;  %s449_s9 = smov 0  }
   0x3   :  { %s451_s10 = smov 0   ;;  %s453_s11 = smov 0  }
   0x4 LB: > { %s274_s12 = sadd.s32 4294967295, %s427_s11   ;;  %s26_s13 = sadd.s32 1, %s423_s10  ;;  %s427_s11 = sphi %s453_s11, %s14_s11   ;;  %s423_s10 = sphi %s451_s10, %s598_s10   ;;  %s419_s9 = sphi %s449_s9, %s597_s9   ;;  %s415_s8 = sphi %s447_s8, %s596_s8   ;;  %s411_s7 = sphi %s445_s7, %s595_s7   ;;  %s407_s6 = sphi %s443_s6, %s594_s6  }
   0x5   : > { %p28_p0 = scmp.ge.s32.totalorder %s26_s13, 2  ;;  %s35_s14 = sadd.s32 1, %s415_s8 }
   0x6   : > { %p42_p1 = scmp.ne.s32.totalorder %s415_s8, %s411_s7  ;;  %p43_p2 = scmp.eq.s32.totalorder %s427_s11, 0 }
   0x7   : > { %s600_s13 = smov (%p28_p0, %s26_s13), 0  ;;  %p48_p4 = scmp.ne.s32.totalorder %s411_s7, %s407_s6 }
   0x8   : > { %p479_p3 = por %p43_p2, %p42_p1  ;;  %s30_s16 = ssub.s32 %s423_s10, %s600_s13 }
   0x9   : > { %p49_p5 = scmp.eq.s32.totalorder %s274_s12, 0  ;;  %p33_p6 = scmp.eq.s32.totalorder %s30_s16, 0 }
   0xa   : > { %p295_p8 = scmp.lt.s32.totalorder %s427_s11, 2  ;;  %s98_s19 = sand.u32 1, %s415_s8  }
   0xb   : > { %p486_p7 = por %p49_p5, %p48_p4  ;;  %s287_s20 = sshll.u32 %s423_s10, 10 }
   0xc   : > { %s492_s18 = scalar_select %p33_p6, %s415_s8, %s35_s14  }
   0xd   : > { %s278_s21 = sshll.u32 %s98_s19, 6  ;;  %s499_s24 = scalar_lea.hbm %s589_s0, %s287_s20 }
   0xe   : > { %s102_s25 = scalar_lea.vmem [#allocation2], %s278_s21  ;;  %p503_p9 = pnand %p295_p8, %p479_p3 }
   0xf   : > { %s111_s26 = sshll.u32 %s102_s25, 4  ;;  %s509_s28 = scalar_lea.sflag [#allocation3], %s98_s19  ;;  %s507_s26 = int_to_ptr.vmem [resolvable:$true] %s111_s26 }
  0x10   : > { %s347_s29 = scalar_lea.hbm %s499_s24, 1024  ;;  %p349_p11 = pneg %p503_p9 }
  0x11   : > { %p348_p10 = scmp.ne.s32.totalorder %s499_s24, %s347_s29  ;;  %s352_s3 = scalar_lea.hbm %s589_s0, 2048 }
  0x12   : > { %p353_p0 = scmp.lt.u32.totalorder %s499_s24, %s589_s0  ;;  %p354_p1 = scmp.lt.u32.totalorder %s352_s3, %s347_s29 }
  0x13   : > { %p350_p12 = pnand %p349_p11, %p348_p10  ;;  %p356_p3 = scmp.lt.u32.totalorder %s347_s29, %s499_s24 }
  0x14   : > { %p355_p2 = por %p354_p1, %p353_p0 }
  0x15   : > { %p351_p13 = pneg %p350_p12 }
  0x16   : > { %p357_p4 = por %p356_p3, %p355_p2 }
  0x18   : > { %p358_p5 = pnand %p357_p4, %p351_p13 }
  0x1a   : > { %361 = shalt.err (!%p358_p5)
}
  0x1b   : > { %s362_s6 = scalar_lea.vmem %s507_s26, 1024  ;;  %s429_s12 = smov [#allocation2]  }
  0x1c   : > { %p363_p6 = scmp.ne.s32.totalorder %s507_s26, %s362_s6  ;;  %s367_s14 = sshll.u32 %s429_s12, 4  ;;  %s368_s14 = int_to_ptr.vmem [resolvable:$false] %s367_s14 }
  0x1d   : > { %s369_s15 = scalar_lea.vmem %s368_s14, 2048  ;;  %p370_p12 = scmp.lt.s32.totalorder %s507_s26, %s368_s14 }
  0x1e   : > { %p365_p8 = pnand %p363_p6, %p349_p11  ;;  %p371_p0 = scmp.lt.s32.totalorder %s369_s15, %s362_s6 }
  0x20   : > { %p366_p10 = pneg %p365_p8  ;;  %p372_p1 = por %p371_p0, %p370_p12 }
  0x22   : > { %p373_p2 = pnand %p372_p1, %p366_p10 }
  0x24   : > { %376 = shalt.err (!%p373_p2)
}
  0x25   : > { %s430_s16 = smov 256   ;;  %s431_s19 = smov 16  }
  0x26   : > { %294 = dma.hbm_to_vmem [thread:$0]  (!%p503_p9), %s499_s24, 1024, %s507_s26, %s509_s28, %s430_s16, %s430_s16, %s431_s19  }
  0x27   : > { %p281_p11 = scmp.ge.s32.totalorder %s427_s11, 1  ;;  %p119_p13 = scmp.lt.s32.totalorder %s427_s11, 3 }
  0x29   : > { %p120_p3 = pnand %p281_p11, %p119_p13 }
  0x2a   : > { %s125_s20 = sand.u32 (!%p120_p3), 1, %s411_s7  }
  0x2b   : > { %123 = sbr.rel (%p120_p3) target bundleno = 204 (0xcc), region = 24  ;;  %s282_s21 = sshll.u32 (!%p120_p3), %s125_s20, 6 }
  0x2c   : > { %s126_s22 = scalar_lea.sflag (!%p120_p3), [#allocation3], %s125_s20  ;;  %s129_s23 = scalar_lea.vmem (!%p120_p3), [#allocation2], %s282_s21 }
  0x32   : > { %402 = dma.done.wait (%p486_p7), %s126_s22, 1024  }
  0x33   : > { %404 = vsyncadd (%p486_p7), %s126_s22, 4294966272  ;;  %p149_p4 = scmp.lt.s32.totalorder %s419_s9, 1  ;;  %vm158_vm0 = vcmask 7168   ;;  %v432_v0 = vmov 0.0   ;;  %v171_v1 = vld [vmem:[%s129_s23 + $0x20] sm:$0xff]  ;;  %v172_v2 = vld [vmem:[%s129_s23 + $0x28] sm:$0xff] }
  0x34   : > { %v167_v3 = vld [vmem:[%s129_s23] sm:$0xff]  ;;  %v181_v4 = vadd.f32 %v172_v2, %v171_v1  ;;  %v168_v5 = vld [vmem:[%s129_s23 + $0x8] sm:$0xff]  ;;  %v173_v6 = vld [vmem:[%s129_s23 + $0x30] sm:$0xff] }
  0x35   : > { %s602_s9 = smov (!%p149_p4, %s419_s9), 1  ;;  %v174_v7 = vld [vmem:[%s129_s23 + $0x38] sm:$0xff]  ;;  %v175_v8 = vadd.f32 %v168_v5, %v167_v3  ;;  %v169_v9 = vld [vmem:[%s129_s23 + $0x10] sm:$0xff] }
  0x36   : > { %s288_s24 = sshll.u32 %s602_s9, 5  ;;  %v170_v10 = vld [vmem:[%s129_s23 + $0x18] sm:$0xff]  ;;  %182 = vadd.xlane.f32.xlu1 %v181_v4  ;;  %v184_v11 = vadd.f32 %v174_v7, %v173_v6 }
  0x37   : > { %s549_s27 = scalar_lea.vmem %s590_s1, %s288_s24  ;;  %176 = vadd.xlane.f32.xlu0 %v175_v8  ;;  %v178_v12 = vadd.f32 %v170_v10, %v169_v9 }
  0x38   : > { %161 = vst.msk [vmem:[%s549_s27 + $0x10] sm:$0xff] %vm158_vm0, %v432_v0  ;;  %159 = vst.msk [vmem:[%s549_s27] sm:$0xff] %vm158_vm0, %v432_v0 }
  0x39   : > { %160 = vst.msk [vmem:[%s549_s27 + $0x8] sm:$0xff] %vm158_vm0, %v432_v0  ;;  %162 = vst.msk [vmem:[%s549_s27 + $0x18] sm:$0xff] %vm158_vm0, %v432_v0 }
  0x3a   : > { %185 = vadd.xlane.f32.xlu1 %v184_v11 }
  0x3b   : > { %179 = vadd.xlane.f32.xlu0 %v178_v12 }
  0x3f   : > { %v165_v13 = vld [vmem:[%s549_s27 + $0x10] sm:$0xff]  ;;  %v163_v14 = vld [vmem:[%s549_s27] sm:$0xff] }
  0x40   : > { %v166_v19 = vld [vmem:[%s549_s27 + $0x18] sm:$0xff]  ;;  %v164_v20 = vld [vmem:[%s549_s27 + $0x8] sm:$0xff] }
  0xc3   : > { %v183_v15 = vpop.xlane.xlu1 %182 }
  0xc4   : > { %v189_v16 = vadd.f32 %v183_v15, %v165_v13  ;;  %v177_v17 = vpop.xlane.xlu0 %176 }
  0xc5   : > { %v187_v18 = vadd.f32 %v177_v17, %v163_v14 }
  0xc6   : > { %194 = vst.msk [vmem:[%s549_s27 + $0x10] sm:$0xff] %vm158_vm0, %v189_v16 }
  0xc7   : > { %192 = vst.msk [vmem:[%s549_s27] sm:$0xff] %vm158_vm0, %v187_v18  ;;  %v186_v21 = vpop.xlane.xlu1 %185 }
  0xc8   : > { %v190_v22 = vadd.f32 %v186_v21, %v166_v19  ;;  %v180_v23 = vpop.xlane.xlu0 %179 }
  0xc9   : > { %v188_v24 = vadd.f32 %v180_v23, %v164_v20 }
  0xca   : > { %195 = vst.msk [vmem:[%s549_s27 + $0x18] sm:$0xff] %vm158_vm0, %v190_v22 }
  0xcb   : > { %193 = vst.msk [vmem:[%s549_s27 + $0x8] sm:$0xff] %vm158_vm0, %v188_v24 }
  0xcc PF: > { %s14_s11 = sadd.s32 1, %s427_s11   ;;  %s594_s6 = smov %s411_s7 }
  0xcd   : > { %p11_p7 = scmp.ge.s32.totalorder %s14_s11, 4   ;;  %s595_s7 = smov %s415_s8 }
  0xce   : > { %s596_s8 = smov %s492_s18  ;;  %s597_s9 = smov %s423_s10 }
  0xcf   : > { %s598_s10 = smov %s600_s13  ;;  %13 = sbr.rel (!%p11_p7) target bundleno = 4 (0x4), region = 68 }
  0xd6   :  { %217 = vsyncpa [#allocation3], 1 }
  0xd7   :  { %219 = vsyncpa [#allocation3 + $0x1], 1 }

</bundles_post_ra>
